<compile_context>
chip_gen: v5e
topology: v5e:2x2
jax: 0.10.0
libtpu: 0.0.40
codegen_flags: <defaults>
</compile_context>

<pallas_src>
from functools import partial

import jax
import jax.numpy as jnp
from jax.experimental import pallas as pl
from jax.experimental.pallas import tpu as pltpu

# Test-time transform constants (the only numeric parameters the pipeline itself defines).
_GRAY_W = (0.2989, 0.587, 0.114)     # torchvision rgb_to_grayscale weights (0.2989, not 0.299)
_VID_MEAN, _VID_STD = 0.421, 0.165   # VideoTransform('test') Normalize
# Constant-folded affine: (gray/255 - mean) / std  ==  wR*r + wG*g + wB*b + bias
_W_R = _GRAY_W[0] / (255.0 * _VID_STD)
_W_G = _GRAY_W[1] / (255.0 * _VID_STD)
_W_B = _GRAY_W[2] / (255.0 * _VID_STD)
_BIAS = -_VID_MEAN / _VID_STD


def _round_up(x, m):
    return ((x + m - 1) // m) * m


def _detect_chip_config():
    """Generation-aware budgets.  Fallback = the previously-proven-safe conservative config."""
    fallback = dict(block_budget=8 << 20, vmem_limit=32 << 20,
                    keep_two_steps=True, compute_dtype=jnp.float32)
    try:
        vmem_phys = int(pltpu.get_tpu_info().vmem_capacity_bytes)
    except Exception:
        return fallback
    if vmem_phys <= 96 * 1024 * 1024:
        # v7x-class: 64 MiB VMEM/TC, 2 TensorCores, ~3.2 TB/s HBM.  Cap the double-buffered
        # block footprint, keep >=2 grid steps so both TCs get work, and do the affine in
        # bf16 (uint8 values are exact in bf16) since the VPU can become the binding slot.
        return dict(block_budget=12 << 20, vmem_limit=48 << 20,
                    keep_two_steps=True, compute_dtype=jnp.bfloat16)
    # v5e / v6e: 128 MiB VMEM, single TensorCore -> big blocks, as few grid steps as possible.
    return dict(block_budget=20 << 20, vmem_limit=64 << 20,
                keep_two_steps=False, compute_dtype=jnp.float32)


_CFG = _detect_chip_config()


# ----------------------------- video hot path ------------------------------
def _video_kernel(v_ref, o_ref, *, cdt):
    # v_ref: (3, Tb, HWp) uint8 — channel-first frames, spatial dims flattened (lane-dense)
    # o_ref: (Tb, HWp)    bfloat16 normalized grayscale
    r = v_ref[0].astype(cdt)            # cast in-register: HBM reads stay uint8
    g = v_ref[1].astype(cdt)
    b = v_ref[2].astype(cdt)
    # Python-float constants are weakly typed -> math stays in cdt (f32 or bf16).
    y = _W_R * r + _W_G * g + _W_B * b + _BIAS
    o_ref[...] = y.astype(o_ref.dtype)


def _pick_frame_block(num_frames, hw_pad, chans, out_bytes, block_budget, keep_two_steps):
    """Frames per grid step: fill the block budget (double-buffered u8 in + bf16 out),
    align to the uint8-native (32,128) tile, and on 2-TC chips keep >= 2 grid steps."""
    per_frame = 2 * (chans + out_bytes) * hw_pad          # x2 = double buffering
    tb = max(8, block_budget // per_frame)                # lip-crop frames: >=8 always fit
    if keep_two_steps and num_frames >= 64:
        tb = min(tb, pl.cdiv(num_frames, 2))              # let both v7x TensorCores work
    if tb >= num_frames or num_frames <= 32:
        return num_frames                                 # full extent: 1 step, always legal
    tb = (tb // 32) * 32 if tb >= 32 else (tb // 8) * 8   # uint8-native sublane packing
    return max(8, min(tb, num_frames))


def video_transform(video_thwc, crop=None):
    """video = torch.tensor(load_video(...)); permute((0,3,1,2)); VideoTransform('test')."""
    cfg = _CFG
    v = jnp.asarray(video_thwc, jnp.uint8)                # stay uint8 until inside the kernel
    T, H, W, C = v.shape
    if crop is not None:                                  # CenterCrop on uint8 (glue)
        h0, w0 = (H - crop) // 2, (W - crop) // 2
        v = v[:, h0:h0 + crop, w0:w0 + crop, :]
        H = W = crop
    hw = H * W
    hw_pad = _round_up(hw, 128)                           # lane-dense output stores
    # NHWC -> (C, T, H*W) on uint8: channel planes lead, spatial dims lane-dense.
    # The crop slice + transpose + (optional) pad fuse into a single uint8 copy in XLA.
    v = v.transpose(3, 0, 1, 2).reshape(C, T, hw)
    if hw_pad != hw:
        v = jnp.pad(v, ((0, 0), (0, 0), (0, hw_pad - hw)))
    tb = _pick_frame_block(T, hw_pad, C, 2, cfg["block_budget"], cfg["keep_two_steps"])
    out = pl.pallas_call(
        partial(_video_kernel, cdt=cfg["compute_dtype"]),
        out_shape=jax.ShapeDtypeStruct((T, hw_pad), jnp.bfloat16),
        grid=(pl.cdiv(T, tb),),
        in_specs=[pl.BlockSpec((C, tb, hw_pad), lambda i: (0, i, 0))],
        out_specs=pl.BlockSpec((tb, hw_pad), lambda i: (i, 0)),
        compiler_params=pltpu.CompilerParams(
            dimension_semantics=("parallel",),
            vmem_limit_bytes=cfg["vmem_limit"]),
    )(v)
    if hw_pad != hw:
        out = out[:, :hw]
    return out.reshape(T, 1, H, W)                        # grayscale NCHW, like torch pipeline


# ----------------------------- audio hot path ------------------------------
def _audio_stats_kernel(w_ref, mono_ref, part_ref):
    # w_ref: (C, rb, L) f32 stereo chunk; mono_ref: (rb, L) mono out;
    # part_ref: (2, rb, L) resident per-position [sum, sum_sq] accumulator (full sublanes).
    @pl.when(pl.program_id(0) == 0)
    def _():
        part_ref[...] = jnp.zeros_like(part_ref)
    mono = jnp.mean(w_ref[...], axis=0)                   # audio_process: mean(dim=0, keepdim)
    mono_ref[...] = mono
    part_ref[0, :, :] = part_ref[0, :, :] + mono
    part_ref[1, :, :] = part_ref[1, :, :] + mono * mono


def _audio_norm_kernel(stats_ref, m_ref, o_ref):
    # stats_ref: (2,) f32 SMEM = [mu, 1/sigma]; m_ref/o_ref: (rb, L) f32 mono chunk
    o_ref[...] = (m_ref[...] - stats_ref[0]) * stats_ref[1]


def audio_transform(waveform_cs, lane=512, block_rows=512, eps=1e-5):
    """audio_process + transpose(1,0) + AudioTransform('test') (utterance layer_norm)."""
    cfg = _CFG
    w = jnp.asarray(waveform_cs, jnp.float32)
    C, S = w.shape
    L = lane                                              # multiple of 128 (lane-dense)
    rows = pl.cdiv(S, L)
    rb = min(block_rows, _round_up(rows, 8))              # ~256K samples / block by default
    rb = max(8, (rb // 8) * 8)
    n_blk = pl.cdiv(rows, rb)
    rows_pad = n_blk * rb
    s_pad = rows_pad * L
    if s_pad != S:
        w = jnp.pad(w, ((0, 0), (0, s_pad - S)))          # zero pad: no effect on sum/sum_sq
    w = w.reshape(C, rows_pad, L)                         # dense (rows, L) sample layout

    # Pass 1: read stereo once -> emit mono + per-position sum / sum-of-squares partials.
    mono, partials = pl.pallas_call(
        _audio_stats_kernel,
        out_shape=(jax.ShapeDtypeStruct((rows_pad, L), jnp.float32),
                   jax.ShapeDtypeStruct((2, rb, L), jnp.float32)),
        grid=(n_blk,),
        in_specs=[pl.BlockSpec((C, rb, L), lambda i: (0, i, 0))],
        out_specs=(pl.BlockSpec((rb, L), lambda i: (i, 0)),
                   pl.BlockSpec((2, rb, L), lambda i: (0, 0, 0))),
        compiler_params=pltpu.CompilerParams(
            dimension_semantics=("arbitrary",),
            vmem_limit_bytes=cfg["vmem_limit"]),
    )(w)

    sums = jnp.sum(partials, axis=(1, 2))                 # tiny (2,) reduction (glue)
    mu = sums[0] / S
    # TODO(synk): one-pass E[x^2]-mu^2 in f32 can drift ~1e-3 vs torch's two-pass variance
    #             for very long utterances / strong DC offset.
    var = jnp.maximum(sums[1] / S - mu * mu, 0.0)
    inv = jax.lax.rsqrt(var + eps)                        # eps=1e-5 matches torch layer_norm
    stats = jnp.stack([mu, inv]).astype(jnp.float32)      # SMEM scalars for pass 2

    # Pass 2: tiled normalize of the mono waveform (stereo is not re-read).
    out = pl.pallas_call(
        _audio_norm_kernel,
        out_shape=jax.ShapeDtypeStruct((rows_pad, L), jnp.float32),
        grid=(n_blk,),
        in_specs=[pl.BlockSpec(memory_space=pltpu.MemorySpace.SMEM),
                  pl.BlockSpec((rb, L), lambda i: (i, 0))],
        out_specs=pl.BlockSpec((rb, L), lambda i: (i, 0)),
        compiler_params=pltpu.CompilerParams(
            dimension_semantics=("parallel",),
            vmem_limit_bytes=cfg["vmem_limit"]),
    )(stats, mono)

    return out.reshape(-1)[:S][:, None]                   # audio.transpose(1, 0) -> (S, 1)


# --------------------------- audiovisual alignment -------------------------
def cut_or_pad(audio_s1, target_len):
    """Glue: pad with zeros or truncate along the sample axis (torch cut_or_pad)."""
    s = audio_s1.shape[0]
    if s < target_len:
        return jnp.pad(audio_s1, ((0, target_len - s), (0, 0)))
    return audio_s1[:target_len]


# --------------------------------- demo ------------------------------------
if __name__ == "__main__":
    key = jax.random.PRNGKey(0)
    kv, ka = jax.random.split(key)

    # Synthetic "loaded" data at small shapes:
    #   read_video -> (T, H, W, 3) uint8 frames
    #   torchaudio.load -> (channels, samples) float waveform, 640 samples / frame (25 fps @ 16 kHz)
    T_frames, H, W, crop = 64, 24, 24, 16
    video_raw = jax.random.randint(
        kv, (T_frames, H, W, 3), 0, 256, dtype=jnp.int32).astype(jnp.uint8)
    waveform = jax.random.normal(ka, (2, T_frames * 640), dtype=jnp.float32)

    # video branch
    video = video_transform(video_raw, crop=crop)    # (T, 1, 16, 16) bf16
    # audio branch
    audio = audio_transform(waveform)                # (S, 1) f32

    # audiovisual branch: frame-rate ratio check + alignment (glue)
    rate_ratio = audio.shape[0] // video.shape[0]
    assert 530 < rate_ratio < 670, "The video frame rate should be between 24 and 30 fps."
    if rate_ratio != 640:
        audio = cut_or_pad(audio, video.shape[0] * 640)

    jax.block_until_ready((video, audio))

    # Sanity checks against a pure-jnp reference of the same math.
    h0, w0 = (H - crop) // 2, (W - crop) // 2
    vf = video_raw.astype(jnp.float32).transpose(0, 3, 1, 2)[:, :, h0:h0 + crop, w0:w0 + crop]
    gray_ref = (_GRAY_W[0] * vf[:, 0] + _GRAY_W[1] * vf[:, 1] + _GRAY_W[2] * vf[:, 2]) / 255.0
    gray_ref = (gray_ref - _VID_MEAN) / _VID_STD
    vid_atol = 8e-2 if _CFG["compute_dtype"] == jnp.bfloat16 else 3e-2   # bf16 output either way
    assert jnp.allclose(video[:, 0].astype(jnp.float32), gray_ref, atol=vid_atol)

    mono_ref = jnp.mean(waveform, axis=0)
    mono_ref = (mono_ref - mono_ref.mean()) * jax.lax.rsqrt(mono_ref.var() + 1e-5)
    assert jnp.allclose(audio[:, 0], mono_ref, atol=2e-3)

    print("KERNEL_OK")
</pallas_src>

<mosaic_0001>
module attributes {stable_mosaic.version = 11 : i64} {
  func.func @_video_kernel(%arg0: i32, %arg1: memref<3x32x256xi8, #tpu.memory_space<vmem>>, %arg2: memref<32x256xbf16, #tpu.memory_space<vmem>>) attributes {dimension_semantics = [#tpu.dimension_semantics<parallel>], iteration_bounds = array<i64: 2>, scalar_prefetch = 0 : i64, scratch_operands = 0 : i64, tpu.core_type = #tpu.core_type<tc>, window_params = [{transform_indices = @transform_0, window_bounds = array<i64: 3, 32, 256>}, {transform_indices = @transform_1, window_bounds = array<i64: 32, 256>}]} {
    %c0 = arith.constant 0 : index
    %c0_0 = arith.constant 0 : index
    %c0_1 = arith.constant 0 : index
    %0 = vector.load %arg1[%c0, %c0_0, %c0_1] : memref<3x32x256xi8, #tpu.memory_space<vmem>>, vector<1x32x256xi8>
    %1 = vector.shape_cast %0 : vector<1x32x256xi8> to vector<32x256xi8>
    %2 = arith.uitofp %1 : vector<32x256xi8> to vector<32x256xf32>
    %c1 = arith.constant 1 : index
    %c0_2 = arith.constant 0 : index
    %c0_3 = arith.constant 0 : index
    %3 = vector.load %arg1[%c1, %c0_2, %c0_3] : memref<3x32x256xi8, #tpu.memory_space<vmem>>, vector<1x32x256xi8>
    %4 = vector.shape_cast %3 : vector<1x32x256xi8> to vector<32x256xi8>
    %5 = arith.uitofp %4 : vector<32x256xi8> to vector<32x256xf32>
    %c2 = arith.constant 2 : index
    %c0_4 = arith.constant 0 : index
    %c0_5 = arith.constant 0 : index
    %6 = vector.load %arg1[%c2, %c0_4, %c0_5] : memref<3x32x256xi8, #tpu.memory_space<vmem>>, vector<1x32x256xi8>
    %7 = vector.shape_cast %6 : vector<1x32x256xi8> to vector<32x256xi8>
    %8 = arith.uitofp %7 : vector<32x256xi8> to vector<32x256xf32>
    %cst = arith.constant 0.00710398098 : f32
    %9 = vector.broadcast %cst : f32 to vector<32x256xf32>
    %10 = arith.mulf %9, %2 : vector<32x256xf32>
    %cst_6 = arith.constant 0.0139512774 : f32
    %11 = vector.broadcast %cst_6 : f32 to vector<32x256xf32>
    %12 = arith.mulf %11, %5 : vector<32x256xf32>
    %13 = arith.addf %10, %12 : vector<32x256xf32>
    %cst_7 = arith.constant 0.00270944741 : f32
    %14 = vector.broadcast %cst_7 : f32 to vector<32x256xf32>
    %15 = arith.mulf %14, %8 : vector<32x256xf32>
    %16 = arith.addf %13, %15 : vector<32x256xf32>
    %cst_8 = arith.constant -2.5515151 : f32
    %17 = vector.broadcast %cst_8 : f32 to vector<32x256xf32>
    %18 = arith.addf %16, %17 : vector<32x256xf32>
    %19 = arith.truncf %18 : vector<32x256xf32> to vector<32x256xbf16>
    %c0_9 = arith.constant 0 : index
    %c0_10 = arith.constant 0 : index
    %20 = vector.load %arg2[%c0_9, %c0_10] : memref<32x256xbf16, #tpu.memory_space<vmem>>, vector<32x256xbf16>
    tpu.vector_store %arg2[%c0_9, %c0_10], %19 {strides = array<i32>} : memref<32x256xbf16, #tpu.memory_space<vmem>>, vector<32x256xbf16>,
    return
  }
  func.func @transform_0(%arg0: i32) -> (i32, i32, i32) {
    %c0_i32 = arith.constant 0 : i32
    %c0_i32_0 = arith.constant 0 : i32
    %c0_i32_1 = arith.constant 0 : i32
    return %c0_i32, %arg0, %c0_i32_0 : i32, i32, i32
  }
  func.func @transform_1(%arg0: i32) -> (i32, i32) {
    %c0_i32 = arith.constant 0 : i32
    %c0_i32_0 = arith.constant 0 : i32
    return %arg0, %c0_i32 : i32, i32
  }
}

</mosaic_0001>

<bundles_post_ra>
// kernel: tpu_custom_call.1
= control target key start
LH: loop header
LB: loop body
LE: loop exit
PB: predicated region body
PF: predicated region fallthrough
CT: control target
= control target key end

     0   :  { %6 = vsyncpa [#allocation3], 0  ;;  %s713_s0 = inlined_call_operand.hbm [shape: u8[3,64,256], index: 0, kind: input, shape index: {}]   ;;  %s714_s1 = inlined_call_operand.hbm [shape: bf16[64,256], index: 1, kind: output, shape index: {}]  }
   0x1   :  { %8 = vsyncpa [#allocation3 + $0x1], 0 }
   0x2   :  { %9 = vsyncpa [#allocation4], 0 }
   0x3   :  { %11 = vsyncpa [#allocation4 + $0x1], 0  ;;  %s550_s6 = smov 0   ;;  %s552_s7 = smov 0  }
   0x4   :  { %s554_s8 = smov 0   ;;  %s556_s9 = smov 0  }
   0x5 LB: > { %s571_s10 = sadd.s32 4294967295, %s533_s9   ;;  %s364_s11 = sadd.s32 4294967294, %s533_s9   ;;  %s533_s9 = sphi %s556_s9, %s722_s9   ;;  %s529_s8 = sphi %s554_s8, %s721_s8   ;;  %s525_s7 = sphi %s552_s7, %s720_s7   ;;  %s521_s6 = sphi %s550_s6, %s719_s6  }
   0x6   : > { %s575_s12 = sadd.s32 1, %s533_s9   ;;  %s24_s13 = sadd.s32 1, %s529_s8 }
   0x7   : > { %s21_s14 = ssub.s32 %s533_s9, %s575_s12  ;;  %p31_p0 = scmp.ne.s32.totalorder %s529_s8, %s525_s7 }
   0x8   : > { %p22_p1 = scmp.eq.s32.totalorder %s21_s14, 0  ;;  %p32_p2 = scmp.eq.s32.totalorder %s533_s9, 0 }
   0x9   : > { %p37_p3 = scmp.ne.s32.totalorder %s525_s7, %s521_s6  ;;  %p38_p4 = scmp.eq.s32.totalorder %s571_s10, 0 }
   0xa   : > { %s587_s15 = scalar_select %p22_p1, %s529_s8, %s24_s13  }
   0xb   : > { %p33_p5 = por %p32_p2, %p31_p0  ;;  %p589_p6 = por %p38_p4, %p37_p3 }
   0xc   : > { %p61_p7 = scmp.eq.s32.totalorder %s571_s10, 1  ;;  %p67_p8 = scmp.eq.s32.totalorder %s364_s11, 1 }
   0xd   : > { %p366_p9 = scmp.ge.s32.totalorder %s533_s9, 2  ;;  %p398_p10 = scmp.lt.s32.totalorder %s533_s9, 2 }
   0xe   : > { %p596_p11 = por %p61_p7, %p31_p0  ;;  %p600_p12 = por %p67_p8, %p37_p3 }
   0xf   : > { %s87_s19 = sand.u32 1, %s529_s8   ;;  %s381_s20 = sshll.u32 %s533_s9, 4 }
  0x10   : > { %s384_s21 = smul.u32 48, %s87_s19  ;;  %s96_s24 = scalar_lea.hbm %s713_s0, %s381_s20 }
  0x11   : > { %p609_p13 = pnand %p398_p10, %p33_p5  ;;  %s97_s26 = sshll.u32 %s96_s24, 4  ;;  %s98_s26 = int_to_ptr.hbm [resolvable:$true] %s97_s26 }
  0x12   : > { %s91_s27 = scalar_lea.vmem [#allocation2], %s384_s21  ;;  %p369_p0 = scmp.ge.s32.totalorder %s533_s9, 1 }
  0x13   : > { %s99_s28 = sshll.u32 %s91_s27, 4  ;;  %s88_s29 = scalar_lea.sflag [#allocation3], %s87_s19  ;;  %s100_s28 = int_to_ptr.vmem [resolvable:$true] %s99_s28 }
  0x14   : > { %s437_s30 = sshra.s32 %s98_s26, 4  ;;  %p441_p2 = pneg %p609_p13  ;;  %s438_s30 = int_to_ptr.hbm [resolvable:$true] %s437_s30 }
  0x15   : > { %s439_s2 = scalar_lea.hbm %s438_s30, 48  ;;  %s444_s5 = scalar_lea.hbm %s713_s0, 96 }
  0x16   : > { %p440_p1 = scmp.ne.s32.totalorder %s438_s30, %s439_s2  ;;  %p445_p5 = scmp.lt.s32.totalorder %s438_s30, %s713_s0 }
  0x17   : > { %p446_p7 = scmp.lt.s32.totalorder %s444_s5, %s439_s2 }
  0x18   : > { %p442_p3 = pnand %p441_p2, %p440_p1 }
  0x19   : > { %p447_p8 = por %p446_p7, %p445_p5 }
  0x1a   : > { %p443_p4 = pneg %p442_p3 }
  0x1c   : > { %p448_p10 = pnand %p447_p8, %p443_p4 }
  0x1e   : > { %451 = shalt.err (!%p448_p10)
}
  0x1f   : > { %s535_s14 = smov 512   ;;  %s536_s19 = smov 256  }
  0x20   : > { %s537_s20 = smov 16   ;;  %p107_p1 = scmp.lt.s32.totalorder %s533_s9, 3 }
  0x21   : > { %393 = dma.hbm_to_vmem [thread:$0]  (!%p609_p13), %s98_s26, 768, %s100_s28, %s88_s29, %s535_s14, %s536_s19, %s537_s20  }
  0x22   : > { %p108_p2 = pnand %p369_p0, %p107_p1 }
  0x23   : > { %s628_s21 = sand.u32 (!%p108_p2), 1, %s525_s7  }
  0x24   : > { %111 = sbr.rel (%p108_p2) target bundleno = 86 (0x56), region = 24  ;;  %s114_s23 = scalar_lea.sflag (!%p108_p2), [#allocation3], %s628_s21 }
  0x25   : > { %s385_s22 = smul.u32 (!%p108_p2), 48, %s628_s21 }
  0x27   : > { %s117_s24 = scalar_lea.vmem (!%p108_p2), [#allocation2], %s385_s22 }
  0x29   : > { %512 = dma.done.wait (%p589_p6), %s114_s23, 768  }
  0x2a   : > { %514 = vsyncadd (%p589_p6), %s114_s23, 4294966528  ;;  %v636_v0 = vld [vmem:[%s117_s24] sm:$0xff]  ;;  %v638_v1 = vld [vmem:[%s117_s24 + $0x8] sm:$0xff]  ;;  %s370_s16 = sshll.u32 %s628_s21, 5  ;;  %s383_s26 = sshll.u32 %s571_s10, 5 }
  0x2b   : > { %v640_v2 = vld [vmem:[%s117_s24 + $0x10] sm:$0xff]  ;;  %v140_v3 = vunpack.c.0.s8 %v636_v0  ;;  %v141_v4 = vunpack.c.0.s8 %v638_v1  ;;  %v644_v5 = vld [vmem:[%s117_s24 + $0x18] sm:$0xff]  ;;  %v647_v7 = vld [vmem:[%s117_s24 + $0x20] sm:$0xff]  ;;  %v142_v9 = vunpack.c.1.s8 %v636_v0  ;;  %v143_v13 = vunpack.c.1.s8 %v638_v1  ;;  %s666_s25 = scalar_lea.vmem [#allocation5], %s370_s16  ;;  %s287_s29 = scalar_lea.hbm %s714_s1, %s383_s26 }
  0x2c   : > { %v167_v6 = vunpack.c.0.s8 %v640_v2  ;;  %v649_v8 = vld [vmem:[%s117_s24 + $0x28] sm:$0xff]  ;;  %v168_v10 = vunpack.c.0.s8 %v644_v5  ;;  %v194_v11 = vunpack.c.0.s8 %v647_v7  ;;  %v169_v33 = vunpack.c.1.s8 %v640_v2  ;;  %s288_s30 = sshll.u32 %s666_s25, 4  ;;  %s290_s10 = sshll.u32 %s287_s29, 4  ;;  %s289_s30 = int_to_ptr.vmem [resolvable:$true] %s288_s30  ;;  %s291_s10 = int_to_ptr.hbm [resolvable:$true] %s290_s10 }
  0x2d   : > { %v195_v12 = vunpack.c.0.s8 %v649_v8  ;;  %v148_v14 = vand.u32 255, %v140_v3  ;;  %v149_v15 = vand.u32 255, %v141_v4  ;;  %v150_v17 = vand.u32 255, %v142_v9  ;;  %s275_s2 = scalar_lea.sflag [#allocation4], %s628_s21  ;;  %s481_s3 = sshra.s32 %s291_s10, 4  ;;  %s482_s3 = int_to_ptr.hbm [resolvable:$true] %s481_s3 }
  0x2e   : > { %v175_v16 = vand.u32 255, %v167_v6  ;;  %v176_v18 = vand.u32 255, %v168_v10  ;;  %v202_v19 = vand.u32 255, %v194_v11  ;;  %v151_v21 = vand.u32 255, %v143_v13  ;;  %s483_s4 = scalar_lea.hbm %s482_s3, 32  ;;  %s487_s13 = scalar_lea.hbm %s714_s1, 64 }
  0x2f   : > { %v203_v20 = vand.u32 255, %v195_v12  ;;  %v156_v22 = vcvt.s32.f32 %v148_v14  ;;  %v157_v23 = vcvt.s32.f32 %v149_v15  ;;  %v158_v25 = vcvt.s32.f32 %v150_v17  ;;  %p484_p6 = scmp.ne.s32.totalorder %s482_s3, %s483_s4  ;;  %p488_p3 = scmp.lt.s32.totalorder %s482_s3, %s714_s1 }
  0x30   : > { %v183_v24 = vcvt.s32.f32 %v175_v16  ;;  %v184_v26 = vcvt.s32.f32 %v176_v18  ;;  %v210_v27 = vcvt.s32.f32 %v202_v19  ;;  %v159_v29 = vcvt.s32.f32 %v151_v21  ;;  %p489_p4 = scmp.lt.s32.totalorder %s487_s13, %s483_s4 }
  0x31   : > { %v211_v28 = vcvt.s32.f32 %v203_v20  ;;  %v218_v30 = vmul.f32 0.007103981, %v156_v22  ;;  %v219_v31 = vmul.f32 0.007103981, %v157_v23  ;;  %v170_v37 = vunpack.c.1.s8 %v644_v5  ;;  %p485_p13 = pnand %p484_p6, %p596_p11 }
  0x32   : > { %v226_v32 = vmul.f32 0.013951277, %v183_v24  ;;  %v227_v34 = vmul.f32 0.013951277, %v184_v26  ;;  %v242_v35 = vmul.f32 0.0027094474, %v210_v27  ;;  %v196_v40 = vunpack.c.1.s8 %v647_v7  ;;  %p490_p5 = por %p489_p4, %p488_p3 }
  0x33   : > { %v243_v36 = vmul.f32 0.0027094474, %v211_v28  ;;  %v177_v39 = vand.u32 255, %v169_v33  ;;  %v197_v41 = vunpack.c.1.s8 %v649_v8  ;;  %v178_v43 = vand.u32 255, %v170_v37  ;;  %p486_p0 = pneg %p485_p13 }
  0x34   : > { %v234_v38 = vadd.f32 %v226_v32, %v218_v30  ;;  %v235_v42 = vadd.f32 %v227_v34, %v219_v31  ;;  %v220_v44 = vmul.f32 0.007103981, %v158_v25  ;;  %v221_v45 = vmul.f32 0.007103981, %v159_v29 }
  0x35   : > { %v185_v47 = vcvt.s32.f32 %v177_v39  ;;  %v204_v48 = vand.u32 255, %v196_v40  ;;  %v205_v49 = vand.u32 255, %v197_v41  ;;  %v186_v51 = vcvt.s32.f32 %v178_v43  ;;  %p491_p7 = pnand %p490_p5, %p486_p0 }
  0x36   : > { %v250_v46 = vadd.f32 %v242_v35, %v234_v38  ;;  %v251_v50 = vadd.f32 %v243_v36, %v235_v42  ;;  %v144_v52 = vunpack.c.2.s8 %v636_v0  ;;  %v145_v53 = vunpack.c.2.s8 %v638_v1 }
  0x37   : > { %v212_v55 = vcvt.s32.f32 %v204_v48  ;;  %v213_v56 = vcvt.s32.f32 %v205_v49  ;;  %v228_v57 = vmul.f32 0.013951277, %v185_v47  ;;  %v229_v59 = vmul.f32 0.013951277, %v186_v51 }
  0x38   : > { %v258_v54 = vadd.f32 -2.551515, %v250_v46  ;;  %v259_v58 = vadd.f32 -2.551515, %v251_v50  ;;  %v152_v60 = vand.u32 255, %v144_v52  ;;  %v153_v61 = vand.u32 255, %v145_v53 }
  0x39   : > { %v236_v62 = vadd.f32 %v228_v57, %v220_v44  ;;  %v244_v63 = vmul.f32 0.0027094474, %v212_v55  ;;  %v245_v3 = vmul.f32 0.0027094474, %v213_v56  ;;  %v171_v4 = vunpack.c.2.s8 %v640_v2 }
  0x3a   : > { %v266_v6 = vpack.c.bf16 %v259_v58, %v258_v54  ;;  %v237_v9 = vadd.f32 %v229_v59, %v221_v45  ;;  %v160_v10 = vcvt.s32.f32 %v152_v60  ;;  %v161_v11 = vcvt.s32.f32 %v153_v61 }
  0x3b   : > { %v252_v12 = vadd.f32 %v244_v63, %v236_v62  ;;  %v172_v13 = vunpack.c.2.s8 %v644_v5  ;;  %v179_v14 = vand.u32 255, %v171_v4  ;;  %v198_v15 = vunpack.c.2.s8 %v647_v7 }
  0x3c   : > { %270 = vst [vmem:[%s666_s25] sm:$0xff] %v266_v6  ;;  %v253_v16 = vadd.f32 %v245_v3, %v237_v9  ;;  %v199_v17 = vunpack.c.2.s8 %v649_v8  ;;  %v222_v18 = vmul.f32 0.007103981, %v160_v10  ;;  %v223_v19 = vmul.f32 0.007103981, %v161_v11 }
  0x3d   : > { %v260_v20 = vadd.f32 -2.551515, %v252_v12  ;;  %v180_v21 = vand.u32 255, %v172_v13  ;;  %v187_v22 = vcvt.s32.f32 %v179_v14  ;;  %v206_v23 = vand.u32 255, %v198_v15 }
  0x3e   : > { %v261_v24 = vadd.f32 -2.551515, %v253_v16  ;;  %v207_v25 = vand.u32 255, %v199_v17  ;;  %v146_v26 = vunpack.c.3.s8 %v636_v0  ;;  %v147_v27 = vunpack.c.3.s8 %v638_v1 }
  0x3f   : > { %v188_v28 = vcvt.s32.f32 %v180_v21  ;;  %v214_v29 = vcvt.s32.f32 %v206_v23  ;;  %v230_v30 = vmul.f32 0.013951277, %v187_v22  ;;  %v173_v31 = vunpack.c.3.s8 %v640_v2 }
  0x40   : > { %v267_v32 = vpack.c.bf16 %v261_v24, %v260_v20  ;;  %v215_v33 = vcvt.s32.f32 %v207_v25  ;;  %v154_v34 = vand.u32 255, %v146_v26  ;;  %v155_v35 = vand.u32 255, %v147_v27 }
  0x41   : > { %v231_v36 = vmul.f32 0.013951277, %v188_v28  ;;  %v238_v37 = vadd.f32 %v230_v30, %v222_v18  ;;  %v246_v38 = vmul.f32 0.0027094474, %v214_v29  ;;  %v174_v39 = vunpack.c.3.s8 %v644_v5 }
  0x42   : > { %271 = vst [vmem:[%s666_s25 + $0x8] sm:$0xff] %v267_v32  ;;  %v247_v40 = vmul.f32 0.0027094474, %v215_v33  ;;  %v162_v41 = vcvt.s32.f32 %v154_v34  ;;  %v163_v0 = vcvt.s32.f32 %v155_v35  ;;  %v181_v1 = vand.u32 255, %v173_v31 }
  0x43   : > { %v239_v42 = vadd.f32 %v231_v36, %v223_v19  ;;  %v254_v43 = vadd.f32 %v246_v38, %v238_v37  ;;  %v182_v44 = vand.u32 255, %v174_v39  ;;  %v200_v2 = vunpack.c.3.s8 %v647_v7 }
  0x44   : > { %v189_v45 = vcvt.s32.f32 %v181_v1  ;;  %v201_v46 = vunpack.c.3.s8 %v649_v8  ;;  %v224_v47 = vmul.f32 0.007103981, %v162_v41  ;;  %v225_v48 = vmul.f32 0.007103981, %v163_v0 }
  0x45   : > { %v255_v49 = vadd.f32 %v247_v40, %v239_v42  ;;  %v262_v50 = vadd.f32 -2.551515, %v254_v43  ;;  %v190_v5 = vcvt.s32.f32 %v182_v44  ;;  %v208_v51 = vand.u32 255, %v200_v2 }
  0x46   : > { %v209_v52 = vand.u32 255, %v201_v46  ;;  %v232_v53 = vmul.f32 0.013951277, %v189_v45 }
  0x47   : > { %v263_v54 = vadd.f32 -2.551515, %v255_v49  ;;  %v216_v55 = vcvt.s32.f32 %v208_v51  ;;  %v233_v56 = vmul.f32 0.013951277, %v190_v5 }
  0x48   : > { %v217_v57 = vcvt.s32.f32 %v209_v52  ;;  %v240_v58 = vadd.f32 %v232_v53, %v224_v47 }
  0x49   : > { %v268_v7 = vpack.c.bf16 %v263_v54, %v262_v50  ;;  %v241_v8 = vadd.f32 %v233_v56, %v225_v48  ;;  %v248_v59 = vmul.f32 0.0027094474, %v216_v55 }
  0x4a   : > { %v249_v60 = vmul.f32 0.0027094474, %v217_v57 }
  0x4b   : > { %272 = vst [vmem:[%s666_s25 + $0x10] sm:$0xff] %v268_v7  ;;  %v256_v61 = vadd.f32 %v248_v59, %v240_v58 }
  0x4c   : > { %v257_v62 = vadd.f32 %v249_v60, %v241_v8 }
  0x4d   : > { %v264_v63 = vadd.f32 -2.551515, %v256_v61 }
  0x4e   : > { %v265_v3 = vadd.f32 -2.551515, %v257_v62 }
  0x50   : > { %v269_v4 = vpack.c.bf16 %v265_v3, %v264_v63 }
  0x52   : > { %273 = vst [vmem:[%s666_s25 + $0x18] sm:$0xff] %v269_v4 }
  0x53   : > { %494 = shalt.err (!%p491_p7)
}
  0x54   : > { %s538_s20 = smov 128   ;;  %s539_s21 = smov 8  }
  0x55   : > { %388 = dma.vmem_to_hbm [thread:$0]  (%p596_p11), %s289_s30, 512, %s291_s10, %s275_s2, %s538_s20, %s538_s20, %s539_s21  }
  0x56 PF: > { %s305_s22 = sand.u32 1, %s521_s6   ;;  %p395_p8 = pnand %p366_p9, %p600_p12 }
  0x57   : > { %s306_s23 = scalar_lea.sflag [#allocation4], %s305_s22 }
  0x58   : > { %p396_p10 = pneg %p395_p8 }
  0x5a   : > { %516 = dma.done.wait (%p396_p10), %s306_s23, 512  }
  0x5b   : > { %518 = vsyncadd (%p396_p10), %s306_s23, 4294966784  ;;  %p14_p1 = scmp.ge.s32.totalorder %s575_s12, 4   ;;  %s719_s6 = smov %s525_s7 }
  0x5c   : > { %s720_s7 = smov %s529_s8  ;;  %s721_s8 = smov %s587_s15 }
  0x5d   : > { %s722_s9 = smov %s575_s12  ;;  %16 = sbr.rel (!%p14_p1) target bundleno = 5 (0x5), region = 71 }
  0x62   :  { %312 = vsyncpa [#allocation3], 1 }
  0x63   :  { %314 = vsyncpa [#allocation3 + $0x1], 1 }
  0x64   :  { %315 = vsyncpa [#allocation4], 1 }
  0x65   :  { %317 = vsyncpa [#allocation4 + $0x1], 1 }

</bundles_post_ra>
